<compile_context>
chip_gen: v6e
topology: v6e:2x2x1
jax: 0.10.0
libtpu: 0.0.40
codegen_flags: <defaults>
</compile_context>

<pallas_src>
import functools
import math

import jax
import jax.numpy as jnp
from jax.experimental import pallas as pl
from jax.experimental.pallas import tpu as pltpu


def _round_up(a, b):
    return -(-a // b) * b


def _cdiv(a, b):
    return -(-a // b)


def _feednet_kernel(*refs, n_layers, use_activation):
    # refs = (x_ref, w0, b0, w1, b1, ..., o_ref)
    x_ref = refs[0]
    o_ref = refs[-1]
    wb_refs = refs[1:-1]

    h = x_ref[...]
    for i in range(n_layers):
        w = wb_refs[2 * i][...]            # [in_i, out_i], MXU operand dtype
        b = wb_refs[2 * i + 1][...]        # [1, out_i], f32
        acc = jnp.dot(h.astype(w.dtype), w,
                      preferred_element_type=jnp.float32)   # f32 accumulate (MXU)
        acc = acc + b                                        # bias add in f32 (VPU)
        if i != n_layers - 1 and use_activation:
            acc = jnp.maximum(acc, 0.0)                      # ReLU between layers
        h = acc
    o_ref[...] = h.astype(o_ref.dtype)


def feednet_forward(x, weights, biases, *, use_activation=True, tile_m=None,
                    mxu_bf16=False):
    """Fused MLP forward.

    x:        [..., in_dim]
    weights:  list of [layer_in_i, layer_out_i]   (transposed vs. PyTorch)
    biases:   list of [layer_out_i]
    """
    n_layers = len(weights)
    assert len(biases) == n_layers

    orig_shape = x.shape
    in_dim = orig_shape[-1]
    out_dim = weights[-1].shape[-1]
    dtype = x.dtype
    itemsize = jnp.dtype(dtype).itemsize

    # MXU operand dtype. NOTE: when x is bf16, f32 weights are downcast to bf16
    # (matches the reference used here; differs from PyTorch default f32 math).
    compute_dtype = jnp.bfloat16 if (mxu_bf16 and dtype == jnp.float32) else dtype
    compute_itemsize = jnp.dtype(compute_dtype).itemsize

    n_rows = math.prod(orig_shape[:-1]) if len(orig_shape) > 1 else 1
    x2d = x.reshape(n_rows, in_dim)

    ws = [w.astype(compute_dtype) for w in weights]               # MXU operands
    bs = [b.astype(jnp.float32).reshape(1, -1) for b in biases]   # f32 bias add
    wb_bytes = (sum(int(w.size) * compute_itemsize for w in ws)
                + sum(int(b.size) * 4 for b in bs))
    max_width = max([w.shape[1] for w in ws] + [in_dim])

    # --- generation-aware VMEM ceiling (leave ~1/8 headroom for Mosaic scratch)
    try:
        vmem_cap = int(pltpu.get_tpu_info().vmem_capacity_bytes)
    except Exception:
        vmem_cap = 64 * 1024 * 1024
    vmem_ceiling = (vmem_cap * 7) // 8      # ~56 MiB on v7x, ~112 MiB on v5e/v6e

    # --- row tiling: size the tile from the VMEM budget (target ~2 MiB of x),
    #     sublane-aligned; keep >=4 grid steps when rows allow so the single
    #     'parallel' axis splits across v7x's two TensorCores.
    sublane = 16 if dtype == jnp.bfloat16 else 8
    if tile_m is None:
        target_x_bytes = 2 * 1024 * 1024
        tile_m = max(sublane, target_x_bytes // max(1, in_dim * itemsize))
        tile_m = min(tile_m, 8192)
        # per-row VMEM footprint: double-buffered x/y tiles + live f32/compute h
        per_row = (2 * in_dim * itemsize + 2 * out_dim * itemsize
                   + max_width * (4 + compute_itemsize))
        budget = vmem_ceiling - 2 * wb_bytes - 4 * 1024 * 1024
        if budget > 0:
            tile_m = min(tile_m, max(sublane, budget // per_row))
        if n_rows >= 4 * sublane:
            tile_m = min(tile_m, _round_up(_cdiv(n_rows, 4), sublane))
    tile_m = max(sublane, _round_up(int(tile_m), sublane))
    tile_m = min(tile_m, _round_up(n_rows, sublane))
    grid_steps = _cdiv(n_rows, tile_m)
    grid = (grid_steps,)

    x_tile_bytes = tile_m * in_dim * itemsize
    y_tile_bytes = tile_m * out_dim * itemsize

    # --- x input spec.  Fallback for tiny tiles + long grid: 3-deep buffering
    #     so the DMA issue latency of sub-microsecond steps is hidden.
    x_spec = pl.BlockSpec((tile_m, in_dim), lambda i: (i, 0))
    x_bufs = 2
    if grid_steps >= 3 and x_tile_bytes < 128 * 1024 and hasattr(pl, "Buffered"):
        try:
            x_spec = pl.BlockSpec((tile_m, in_dim), lambda i: (i, 0),
                                  pipeline_mode=pl.Buffered(3))
            x_bufs = 3
        except TypeError:   # older jax without pipeline_mode
            pass

    # --- weights/biases: constant block index -> VMEM-resident across the grid.
    #     If reused for wide MLPs, drop to single buffering so the 2x copies
    #     don't eat the row-tile budget on v7x (64 MiB VMEM).
    single_buf_weights = (2 * wb_bytes > 16 * 1024 * 1024
                          and hasattr(pl, "Buffered"))
    w_bufs = 1 if single_buf_weights else 2

    in_specs = [x_spec]
    operands = [x2d]
    for w, b in zip(ws, bs):
        w_spec = pl.BlockSpec(w.shape, lambda i: (0, 0))
        b_spec = pl.BlockSpec(b.shape, lambda i: (0, 0))
        if single_buf_weights:
            try:
                w_spec = pl.BlockSpec(w.shape, lambda i: (0, 0),
                                      pipeline_mode=pl.Buffered(1))
                b_spec = pl.BlockSpec(b.shape, lambda i: (0, 0),
                                      pipeline_mode=pl.Buffered(1))
            except TypeError:
                pass
        in_specs.append(w_spec)
        in_specs.append(b_spec)
        operands.append(w)
        operands.append(b)

    # Output block's last dim equals the full array dim (legal even though
    # out_dim < 128).  Kernel is mem-bound, so no 128-lane padding.
    out_specs = pl.BlockSpec((tile_m, out_dim), lambda i: (i, 0))

    # --- VMEM budget: buffered x/y tiles + resident weights + live intermediates
    h_bytes = tile_m * max_width * (4 + compute_itemsize)
    vmem_est = (x_bufs * x_tile_bytes + 2 * y_tile_bytes
                + w_bufs * wb_bytes + h_bytes)
    vmem_limit = min(vmem_ceiling,
                     max(vmem_est + 2 * 1024 * 1024, 16 * 1024 * 1024))

    # --- cost estimate for XLA scheduling
    flops = 2 * n_rows * sum(w.shape[0] * w.shape[1] for w in ws)
    bytes_accessed = (n_rows * in_dim * itemsize + wb_bytes
                      + n_rows * out_dim * itemsize)
    cost = pl.CostEstimate(flops=flops, transcendentals=0,
                           bytes_accessed=bytes_accessed)

    kernel = functools.partial(
        _feednet_kernel, n_layers=n_layers, use_activation=use_activation
    )

    y2d = pl.pallas_call(
        kernel,
        grid=grid,
        in_specs=in_specs,
        out_specs=out_specs,
        out_shape=jax.ShapeDtypeStruct((n_rows, out_dim), dtype),
        compiler_params=pltpu.CompilerParams(
            dimension_semantics=("parallel",),
            vmem_limit_bytes=int(vmem_limit),
        ),
        cost_estimate=cost,
    )(*operands)

    return y2d.reshape(orig_shape[:-1] + (out_dim,))


def _init_feednet_params(key, in_dim, out_dim, inner_dim, n_layers):
    """Linear-style init (uniform +-1/sqrt(fan_in)); shapes match the module."""
    weights, biases = [], []
    for i in range(n_layers):
        layer_in = in_dim if i == 0 else inner_dim[i - 1]
        layer_out = out_dim if i == n_layers - 1 else inner_dim[i]
        key, kw, kb = jax.random.split(key, 3)
        bound = 1.0 / (layer_in ** 0.5)
        w = jax.random.uniform(kw, (layer_in, layer_out), jnp.float32, -bound, bound)
        b = jax.random.uniform(kb, (layer_out,), jnp.float32, -bound, bound)
        weights.append(w)   # stored transposed: [layer_in, layer_out]
        biases.append(b)
    return weights, biases


def _reference_forward(x, weights, biases, use_activation=True):
    """Pure-JAX reference with the same dtype semantics as the kernel."""
    dt = x.dtype
    h = x
    n = len(weights)
    for i, (w, b) in enumerate(zip(weights, biases)):
        acc = jnp.dot(h.astype(dt), w.astype(dt),
                      preferred_element_type=jnp.float32)
        acc = acc + b.astype(jnp.float32)
        if i != n - 1 and use_activation:
            acc = jnp.maximum(acc, 0.0)
        h = acc.astype(dt) if i != n - 1 else acc
    return h.astype(dt)


if __name__ == "__main__":
    key = jax.random.PRNGKey(0)
    key, kx, kp, kx2 = jax.random.split(key, 4)

    # FeedNet(in_dim=32, out_dim=16, type='mlp', n_layers=2, inner_dim=[64],
    #         activaion=nn.ReLU())
    in_dim, out_dim = 32, 16
    inner_dim = [64]
    n_layers = 2
    weights, biases = _init_feednet_params(kp, in_dim, out_dim, inner_dim, n_layers)

    # --- small f32 check (B=2, T=8): single-step grid ------------------------
    B, T = 2, 8
    x = jax.random.normal(kx, (B, T, in_dim), jnp.float32)
    y = jax.block_until_ready(feednet_forward(x, weights, biases, use_activation=True))
    y_ref = _reference_forward(x, weights, biases, use_activation=True)
    assert y.shape == (B, T, out_dim)
    assert jnp.allclose(y, y_ref, atol=1e-5, rtol=1e-5), "f32 mismatch vs reference"

    # --- larger ragged f32 check: multi-step grid + partial last block -------
    B2, T2 = 4, 500                      # n_rows=2000 -> tile_m=504, grid=4
    x2 = jax.random.normal(kx2, (B2, T2, in_dim), jnp.float32)
    y2 = jax.block_until_ready(feednet_forward(x2, weights, biases, use_activation=True))
    y2_ref = _reference_forward(x2, weights, biases, use_activation=True)
    assert y2.shape == (B2, T2, out_dim)
    assert jnp.allclose(y2, y2_ref, atol=1e-4, rtol=1e-4), "ragged f32 mismatch"

    # --- bf16 operand path (f32 accumulate) ----------------------------------
    xb = x.astype(jnp.bfloat16)
    yb = jax.block_until_ready(feednet_forward(xb, weights, biases, use_activation=True))
    yb_ref = _reference_forward(xb, weights, biases, use_activation=True)
    assert jnp.allclose(yb.astype(jnp.float32), yb_ref.astype(jnp.float32),
                        atol=5e-2, rtol=5e-2), "bf16 mismatch vs reference"

    # --- opt-in bf16 MXU path for f32 inputs (loose tolerance; changes numerics)
    ym = jax.block_until_ready(
        feednet_forward(x, weights, biases, use_activation=True, mxu_bf16=True))
    assert jnp.allclose(ym, y_ref, atol=5e-2, rtol=5e-2), "mxu_bf16 mismatch"

    print("KERNEL_OK")
</pallas_src>

<mosaic_0001>
module attributes {stable_mosaic.version = 11 : i64} {
  func.func @_feednet_kernel(%arg0: i32, %arg1: memref<16x32xf32, #tpu.memory_space<vmem>>, %arg2: memref<32x64xf32, #tpu.memory_space<vmem>>, %arg3: memref<1x64xf32, #tpu.memory_space<vmem>>, %arg4: memref<64x16xf32, #tpu.memory_space<vmem>>, %arg5: memref<1x16xf32, #tpu.memory_space<vmem>>, %arg6: memref<16x16xf32, #tpu.memory_space<vmem>>) attributes {dimension_semantics = [#tpu.dimension_semantics<parallel>], iteration_bounds = array<i64: 1>, scalar_prefetch = 0 : i64, scratch_operands = 0 : i64, tpu.core_type = #tpu.core_type<tc>, window_params = [{transform_indices = @transform_0, window_bounds = array<i64: 16, 32>}, {pipeline_mode = #tpu.pipeline_mode<synchronous>, transform_indices = @transform_1, window_bounds = array<i64: 32, 64>}, {pipeline_mode = #tpu.pipeline_mode<synchronous>, transform_indices = @transform_2, window_bounds = array<i64: 1, 64>}, {pipeline_mode = #tpu.pipeline_mode<synchronous>, transform_indices = @transform_3, window_bounds = array<i64: 64, 16>}, {pipeline_mode = #tpu.pipeline_mode<synchronous>, transform_indices = @transform_4, window_bounds = array<i64: 1, 16>}, {transform_indices = @transform_5, window_bounds = array<i64: 16, 16>}]} {
    %c0 = arith.constant 0 : index
    %c0_0 = arith.constant 0 : index
    %0 = vector.load %arg1[%c0, %c0_0] : memref<16x32xf32, #tpu.memory_space<vmem>>, vector<16x32xf32>
    %c0_1 = arith.constant 0 : index
    %c0_2 = arith.constant 0 : index
    %1 = vector.load %arg2[%c0_1, %c0_2] : memref<32x64xf32, #tpu.memory_space<vmem>>, vector<32x64xf32>
    %c0_3 = arith.constant 0 : index
    %c0_4 = arith.constant 0 : index
    %2 = vector.load %arg3[%c0_3, %c0_4] : memref<1x64xf32, #tpu.memory_space<vmem>>, vector<1x64xf32>
    %cst = arith.constant dense<0.000000e+00> : vector<16x64xf32>
    %3 = tpu.matmul %0, %1, %cst {dimension_numbers = #tpu.dot_dimension_numbers<[1], [0], [0], [1], [0, 0, 1, 1], [], []>} : vector<16x32xf32>, vector<32x64xf32>, vector<16x64xf32> -> vector<16x64xf32>
    %4 = vector.broadcast %2 : vector<1x64xf32> to vector<16x64xf32>
    %5 = arith.addf %3, %4 : vector<16x64xf32>
    %cst_5 = arith.constant 0.000000e+00 : f32
    %6 = vector.broadcast %cst_5 : f32 to vector<16x64xf32>
    %7 = arith.maximumf %5, %6 : vector<16x64xf32>
    %c0_6 = arith.constant 0 : index
    %c0_7 = arith.constant 0 : index
    %8 = vector.load %arg4[%c0_6, %c0_7] : memref<64x16xf32, #tpu.memory_space<vmem>>, vector<64x16xf32>
    %c0_8 = arith.constant 0 : index
    %c0_9 = arith.constant 0 : index
    %9 = vector.load %arg5[%c0_8, %c0_9] : memref<1x16xf32, #tpu.memory_space<vmem>>, vector<1x16xf32>
    %cst_10 = arith.constant dense<0.000000e+00> : vector<16x16xf32>
    %10 = tpu.matmul %7, %8, %cst_10 {dimension_numbers = #tpu.dot_dimension_numbers<[1], [0], [0], [1], [0, 0, 1, 1], [], []>} : vector<16x64xf32>, vector<64x16xf32>, vector<16x16xf32> -> vector<16x16xf32>
    %11 = vector.broadcast %9 : vector<1x16xf32> to vector<16x16xf32>
    %12 = arith.addf %10, %11 : vector<16x16xf32>
    %c0_11 = arith.constant 0 : index
    %c0_12 = arith.constant 0 : index
    %13 = vector.load %arg6[%c0_11, %c0_12] : memref<16x16xf32, #tpu.memory_space<vmem>>, vector<16x16xf32>
    tpu.vector_store %arg6[%c0_11, %c0_12], %12 {strides = array<i32>} : memref<16x16xf32, #tpu.memory_space<vmem>>, vector<16x16xf32>,
    return
  }
  func.func @transform_0(%arg0: i32) -> (i32, i32) {
    %c0_i32 = arith.constant 0 : i32
    %c0_i32_0 = arith.constant 0 : i32
    return %arg0, %c0_i32 : i32, i32
  }
  func.func @transform_1(%arg0: i32) -> (i32, i32) {
    %c0_i32 = arith.constant 0 : i32
    %c0_i32_0 = arith.constant 0 : i32
    %c0_i32_1 = arith.constant 0 : i32
    return %c0_i32, %c0_i32_0 : i32, i32
  }
  func.func @transform_2(%arg0: i32) -> (i32, i32) {
    %c0_i32 = arith.constant 0 : i32
    %c0_i32_0 = arith.constant 0 : i32
    %c0_i32_1 = arith.constant 0 : i32
    return %c0_i32, %c0_i32_0 : i32, i32
  }
  func.func @transform_3(%arg0: i32) -> (i32, i32) {
    %c0_i32 = arith.constant 0 : i32
    %c0_i32_0 = arith.constant 0 : i32
    %c0_i32_1 = arith.constant 0 : i32
    return %c0_i32, %c0_i32_0 : i32, i32
  }
  func.func @transform_4(%arg0: i32) -> (i32, i32) {
    %c0_i32 = arith.constant 0 : i32
    %c0_i32_0 = arith.constant 0 : i32
    %c0_i32_1 = arith.constant 0 : i32
    return %c0_i32, %c0_i32_0 : i32, i32
  }
  func.func @transform_5(%arg0: i32) -> (i32, i32) {
    %c0_i32 = arith.constant 0 : i32
    %c0_i32_0 = arith.constant 0 : i32
    return %arg0, %c0_i32 : i32, i32
  }
}

</mosaic_0001>

<bundles_post_ra>
// kernel: tpu_custom_call.1
= control target key start
LH: loop header
LB: loop body
LE: loop exit
PB: predicated region body
PF: predicated region fallthrough
CT: control target
= control target key end

     0   :  { %vm34_vm0 = vcmask 261120   ;;  %s397_s0 = inlined_call_operand.vmem [shape: f32[16,32], index: 0, kind: input, shape index: {}]   ;;  %s398_s1 = inlined_call_operand.vmem [shape: f32[32,64], index: 1, kind: input, shape index: {}]   ;;  %s399_s2 = inlined_call_operand.vmem [shape: f32[1,64], index: 2, kind: input, shape index: {}]   ;;  %s400_s3 = inlined_call_operand.vmem [shape: f32[64,16], index: 3, kind: input, shape index: {}]   ;;  %s401_s4 = inlined_call_operand.vmem [shape: f32[1,16], index: 4, kind: input, shape index: {}]   ;;  %s402_s5 = inlined_call_operand.hbm [shape: f32[16,16], index: 5, kind: output, shape index: {}]  }
   0x1   :  { %v26_v0 = vld [vmem:[%s398_s1 + $0x18] sm:$0xff]  ;;  %v25_v1 = vld [vmem:[%s398_s1 + $0x10] sm:$0xff]  ;;  %v21_v2 = vld [vmem:[%s397_s0] sm:$0xff] }
   0x2   :  { %256 = vmatprep.subr.mxu0 %v26_v0  ;;  %v24_v3 = vld [vmem:[%s398_s1 + $0x8] sm:$0xff]  ;;  %264 = vmatprep.mubr.msk.f32.mxu0 %vm34_vm0, %v21_v2  ;;  %v125_v4 = vld [vmem:[%s400_s3 + $0x38] sm:$0xff]  ;;  %v124_v5 = vld [vmem:[%s400_s3 + $0x30] sm:$0xff] }
   0x3   :  { %257 = vmatpush3.msra.mxu0 %v26_v0  ;;  %267 = vmatprep.subr.mxu1 %v125_v4 }
   0x4   :  { %258 = vmatprep.subr.mxu0 %v25_v1 }
   0x5   :  { %10 = vsyncpa [#allocation3], 0  ;;  %259 = vmatpush3.msra.mxu0 %v25_v1  ;;  %v23_v6 = vld [vmem:[%s398_s1] sm:$0xff]  ;;  %268 = vmatpush3.msra.mxu1 %v125_v4  ;;  %v123_v7 = vld [vmem:[%s400_s3 + $0x28] sm:$0xff]  ;;  %vm133_vm1 = vcmask 523264   ;;  %vm215_vm2 = vcmask 130048  }
   0x6   :  { %260 = vmatprep.subr.mxu0 %v24_v3  ;;  %269 = vmatprep.subr.mxu1 %v124_v5  ;;  %v22_v8 = vld [vmem:[%s397_s0 + $0x8] sm:$0xff]  ;;  %v122_v9 = vld [vmem:[%s400_s3 + $0x20] sm:$0xff]  ;;  %v121_v10 = vld [vmem:[%s400_s3 + $0x18] sm:$0xff] }
   0x7   :  { %261 = vmatpush3.msra.mxu0 %v24_v3  ;;  %270 = vmatpush3.msra.mxu1 %v124_v5  ;;  %v120_v11 = vld [vmem:[%s400_s3 + $0x10] sm:$0xff]  ;;  %v119_v12 = vld [vmem:[%s400_s3 + $0x8] sm:$0xff]  ;;  %v118_v13 = vld [vmem:[%s400_s3] sm:$0xff]  ;;  %s311_s3 = smov [#allocation2]  }
   0x8   :  { %262 = vmatprep.subr.mxu0 %v23_v6  ;;  %271 = vmatprep.subr.mxu1 %v123_v7  ;;  %v234_v14 = vld [vmem:[%s399_s2] ss:$0 sm:$0xff]  ;;  %s223_s23 = sshll.u32 %s311_s3, 4  ;;  %s224_s23 = int_to_ptr.vmem [resolvable:$true] %s223_s23 }
   0x9   :  { %263 = vmatpush3.msra.mxu0 %v23_v6  ;;  %272 = vmatpush3.msra.mxu1 %v123_v7  ;;  %v237_v21 = vld [vmem:[%s401_s4] ss:$0 sm:$0xff]  ;;  %s289_s2 = scalar_lea.vmem %s224_s23, 256  ;;  %p294_p1 = scmp.lt.s32.totalorder %s224_s23, %s224_s23 }
   0xa   :  { %265 = vmatmul.mubr.msk.f32.vlgmr.msra.gmra.mxu0 %vm34_vm0, %v22_v8  ;;  %273 = vmatprep.subr.mxu1 %v122_v9  ;;  %p290_p0 = scmp.ne.s32.totalorder %s224_s23, %s289_s2  ;;  %p295_p2 = scmp.lt.s32.totalorder %s289_s2, %s289_s2 }
   0xb   :  { %274 = vmatpush3.msra.mxu1 %v122_v9 }
   0xc   :  { %275 = vmatprep.subr.mxu1 %v121_v10  ;;  %p296_p3 = por %p295_p2, %p294_p1 }
   0xd   :  { %276 = vmatpush3.msra.mxu1 %v121_v10 }
   0xe   :  { %277 = vmatprep.subr.mxu1 %v120_v11  ;;  %p297_p4 = pnand %p296_p3, %p290_p0 }
   0xf   :  { %278 = vmatpush3.msra.mxu1 %v120_v11 }
  0x10   :  { %279 = vmatprep.subr.mxu1 %v119_v12 }
  0x11   :  { %280 = vmatpush3.msra.mxu1 %v119_v12 }
  0x12   :  { %281 = vmatprep.subr.mxu1 %v118_v13 }
  0x13   :  { %282 = vmatpush3.msra.mxu1 %v118_v13 }
  0xca   :  { %v266_v15 = vpop.f32.mrf.mxu0 }
  0xcb   :  { %v113_v16 = vadd.f32 %v266_v15, %v234_v14 }
  0xcc   :  { %v107_v17 = vpop.f32.mrf.mxu0 }
  0xcd   :  { %v108_v18 = vadd.f32 %v234_v14, %v107_v17  ;;  %v117_v20 = vmax.f32 %v113_v16, 0.0 }
  0xcf   :  { %v116_v19 = vmax.f32 %v108_v18, 0.0 }
  0xd1   :  { %283 = vmatprep.mubr.msk.f32.mxu1 %vm133_vm1, %v116_v19 }
  0xd2   :  { %284 = vmatmul.mubr.msk.f32.vlgmr.msra.gmra.mxu1 %vm133_vm1, %v117_v20 }
 0x192   :  { %v285_v22 = vpop.f32.mrf.mxu1 }
 0x193   :  { %v212_v23 = vadd.f32 %v285_v22, %v237_v21 }
 0x194   :  { %v206_v24 = vpop.f32.mrf.mxu1 }
 0x195   :  { %217 = vst.msk [vmem:[#allocation2 + $0x8] sm:$0xff] %vm215_vm2, %v212_v23  ;;  %v207_v25 = vadd.f32 %v237_v21, %v206_v24 }
 0x197   :  { %216 = vst.msk [vmem:[#allocation2] sm:$0xff] %vm215_vm2, %v207_v25 }
 0x198   :  { %300 = shalt.err (!%p297_p4)
}
 0x199   :  { %s312_s24 = smov 128   ;;  %s313_s25 = smov 8  }
 0x19a   :  { %229 = dma.vmem_to_hbm [thread:$0]  %s224_s23, 256, %s402_s5, [#allocation3], %s312_s24, %s312_s24, %s313_s25  }
 0x19b   :  { %309 = dma.done.wait [#allocation3], 256  }
 0x19c   :  { %310 = vsyncadd [#allocation3], 4294967040 }
 0x19d   :  { %233 = vsyncpa [#allocation3], 1 }

</bundles_post_ra>
